<compile_context>
chip_gen: v7x
topology: tpu7x:2x2x1
jax: 0.10.0
libtpu: 0.0.40
codegen_flags: <defaults>
</compile_context>

<pallas_src>
import functools

import jax
import jax.numpy as jnp
from jax import lax
from jax.experimental import pallas as pl
from jax.experimental.pallas import tpu as pltpu


# ---------------------------------------------------------------------------
# Hardware-aware defaults
# ---------------------------------------------------------------------------
_VMEM_CAP = None
_BUFFERED_ONE_OK = None


def _vmem_capacity_bytes():
    """Physical VMEM per core (0 if unknown)."""
    global _VMEM_CAP
    if _VMEM_CAP is None:
        try:
            _VMEM_CAP = int(getattr(pltpu.get_tpu_info(), "vmem_capacity_bytes"))
        except Exception:
            _VMEM_CAP = 0
    return _VMEM_CAP


def _vmem_limit_bytes():
    cap = _vmem_capacity_bytes()
    if cap <= 0:
        return 48 * 1024 * 1024                      # safe on v5e/v6e/v7x
    # v5e/v6e (128 MiB): ~100 MiB; v7x (64 MiB): ~54 MiB.
    return min(100 * 1024 * 1024, int(cap * 0.85))


def _default_q_tile():
    # Larger 256-row query tiles on v5e/v6e (128 MiB VMEM); 128 on v7x/unknown.
    return 256 if _vmem_capacity_bytes() >= 100 * 1024 * 1024 else 128


def _buffered_one_supported():
    """Probe whether pipeline_mode=pl.Buffered(1) single-buffering works."""
    global _BUFFERED_ONE_OK
    if _BUFFERED_ONE_OK is not None:
        return _BUFFERED_ONE_OK

    def _probe(x_ref, o_ref):
        o_ref[...] = x_ref[...] * 2.0

    try:
        y = pl.pallas_call(
            _probe,
            out_shape=jax.ShapeDtypeStruct((8, 128), jnp.float32),
            grid=(2,),
            in_specs=[pl.BlockSpec((8, 128), lambda i: (0, 0),
                                   pipeline_mode=pl.Buffered(1))],
            out_specs=pl.BlockSpec((8, 128), lambda i: (0, 0)),
        )(jnp.ones((8, 128), jnp.float32))
        y = jax.block_until_ready(y)
        _BUFFERED_ONE_OK = bool(jnp.allclose(y, 2.0))
    except Exception:
        _BUFFERED_ONE_OK = False
    return _BUFFERED_ONE_OK


def _round_up(x, m):
    return (x + m - 1) // m * m


# ---------------------------------------------------------------------------
# Kernel 1: K/V projection only (Q is fused into stage 2).
# grid = (B, N_pad // tile_n); both axes parallel.
# K/V are written in bf16 with a leading head-group axis: (B, G, N_pad, gw).
# ---------------------------------------------------------------------------
def _kv_proj_kernel(x_ref, wkv_ref, k_ref, v_ref, *, gw, n_groups):
    x = x_ref[0]                                            # (T, C) native dtype
    C = x.shape[1]
    # One MXU matmul, f32 accumulation; no operand upcast.
    kv = jnp.dot(x, wkv_ref[...], preferred_element_type=jnp.float32)  # (T, 2C)
    # PyTorch's reshape(B, N, 3, H, Dh) splits 3C contiguously as (3, H, Dh),
    # so K and V are contiguous C-wide column blocks; split them further into
    # lane-dense head groups of width gw (128 for Dh=64 head pairs).
    for g in range(n_groups):
        k_ref[0, g] = kv[:, g * gw:(g + 1) * gw].astype(k_ref.dtype)
        v_ref[0, g] = kv[:, C + g * gw:C + (g + 1) * gw].astype(v_ref.dtype)


# ---------------------------------------------------------------------------
# Kernel 2: fused Q projection + per-head attention + output projection.
# grid = (B, N_pad // tile_n); both axes parallel.
# ---------------------------------------------------------------------------
def _attn_proj_kernel(x_ref, wq_ref, k_ref, v_ref, wproj_ref, bproj_ref,
                      o_ref, q_sc, y_sc, *, num_heads, heads_per_group, scale,
                      n_valid, compute_dtype, unroll_heads):
    x = x_ref[0]                                            # (T, C)
    T, C = x.shape
    N = k_ref.shape[2]                                      # padded seq length
    Dh = C // num_heads
    gw = heads_per_group * Dh
    n_groups = num_heads // heads_per_group

    # Fused Q projection (saves the (B,N,C) HBM round trip of Q); the softmax
    # scale is folded in here (touches T*C elements, not H*T*N logits).  Q is
    # stored once into a bf16 VMEM scratch with a leading group axis so the
    # head-group loop only performs leading-dim dynamic indexing.
    q = jnp.dot(x, wq_ref[...], preferred_element_type=jnp.float32) * scale
    q = q.astype(compute_dtype)
    for g in range(n_groups):
        q_sc[g] = q[:, g * gw:(g + 1) * gw]

    # Key-padding mask bias (hoisted out of the head loop).
    if n_valid < N:
        kpos = lax.broadcasted_iota(jnp.int32, (1, N), 1)
        key_bias = jnp.where(kpos < n_valid, 0.0, -1e30).astype(jnp.float32)
    else:
        key_bias = None

    # y_sc accumulates the output projection group-by-group (the proj matmul's
    # contraction axis is split over head groups), so no (T, C) attention
    # output scratch and no lane-masked stores are needed.  Initialize with
    # the bias; proj_drop(p=0.0) is an identity.
    y_sc[...] = jnp.broadcast_to(bproj_ref[...].astype(jnp.float32), (T, C))

    def group_body(g):
        qg = q_sc[g]                                        # (T, gw)  bf16
        kg = k_ref[0, g]                                    # (N, gw)  bf16
        vg = v_ref[0, g]                                    # (N, gw)  bf16
        ohs = []
        for hh in range(heads_per_group):
            lo = hh * Dh
            qh = qg[:, lo:lo + Dh]
            kh = kg[:, lo:lo + Dh]
            vh = vg[:, lo:lo + Dh]
            # scores = qh @ kh^T (contract Dh): bf16 operands, f32 MXU acc.
            s = lax.dot_general(qh, kh, (((1,), (1,)), ((), ())),
                                preferred_element_type=jnp.float32)   # (T, N)
            if key_bias is not None:
                s = s + key_bias
            s = s - jnp.max(s, axis=-1, keepdims=True)
            p = jnp.exp(s)                                  # (T, N) f32
            # attn_drop(p=0.0) is an identity.
            # Un-normalized P @ V (P cast to bf16 for the full-rate MXU path),
            # then normalize with an EUP approx reciprocal on (T, 1) row sums.
            oh = jnp.dot(p.astype(compute_dtype), vh,
                         preferred_element_type=jnp.float32)          # (T, Dh)
            inv_l = pl.reciprocal(jnp.sum(p, axis=-1, keepdims=True),
                                  approx=True)
            ohs.append(oh * inv_l)
        og = ohs[0] if heads_per_group == 1 else jnp.concatenate(ohs, axis=-1)
        # Partial output projection for this head group's gw `out` columns.
        y_sc[...] += jnp.dot(og.astype(wproj_ref.dtype), wproj_ref[g],
                             preferred_element_type=jnp.float32)

    if unroll_heads:
        # Small H: static unroll (ViT-S/-Ti style, or the small test config).
        for g in range(n_groups):
            group_body(g)
    else:
        # Large H (ViT-B/L): a real loop bounds vreg live ranges / spills.
        def body(g, carry):
            group_body(g)
            return carry
        lax.fori_loop(0, n_groups, body, 0)

    o_ref[0] = y_sc[...].astype(o_ref.dtype)


# ---------------------------------------------------------------------------
# Wrapper
# ---------------------------------------------------------------------------
def attention_forward(x, w_qkv, w_proj, b_proj, *, num_heads, q_tile=None,
                      attn_dtype=jnp.bfloat16, single_buffer_consts=None):
    """Forward of the PyTorch `Attention` module (with_qkv=True, no qkv bias)."""
    B, N, C = x.shape
    assert C % num_heads == 0, "C must be divisible by num_heads"
    head_dim = C // num_heads
    scale = head_dim ** (-0.5)            # qk_scale=None -> head_dim ** -0.5

    # Lane-dense head grouping: pairs for Dh=64, quads for Dh=32, etc.
    if head_dim < 128 and 128 % head_dim == 0 and \
            num_heads % (128 // head_dim) == 0:
        heads_per_group = 128 // head_dim
    else:
        heads_per_group = 1
    gw = heads_per_group * head_dim
    n_groups = num_heads // heads_per_group

    # Query-row tiling; pad N up so real ViT lengths (e.g. 197) still tile.
    if q_tile is None:
        q_tile = _default_q_tile()
    tile_n = min(q_tile, _round_up(N, 8))
    n_pad = _round_up(N, tile_n)
    x_p = jnp.pad(x, ((0, 0), (0, n_pad - N), (0, 0))) if n_pad != N else x

    # Column split of the fused qkv weight: Q columns feed stage 2 directly
    # (Q never round-trips through HBM); K/V columns feed stage 1.
    w_q = w_qkv[:, :C]
    w_kv = w_qkv[:, C:]
    # Group-leading proj weight so the head-group loop indexes a leading dim.
    w_proj_g = w_proj.reshape(n_groups, gw, C)
    b_proj2d = b_proj.reshape(1, C)

    if single_buffer_consts is None:
        single_buffer_consts = _buffered_one_supported()

    def const_spec(block_shape, index_map):
        # Constant-index blocks (weights, resident full-sequence K/V): the
        # default double buffer is pure VMEM waste -> single-buffer them.
        if single_buffer_consts:
            return pl.BlockSpec(block_shape, index_map,
                                pipeline_mode=pl.Buffered(1))
        return pl.BlockSpec(block_shape, index_map)

    compiler_params = pltpu.CompilerParams(
        dimension_semantics=("parallel", "parallel"),
        vmem_limit_bytes=_vmem_limit_bytes())

    grid = (B, n_pad // tile_n)

    # --- Stage 1: K/V projection, stored in bf16 (halves HBM + VMEM) --------
    kv_kernel = functools.partial(_kv_proj_kernel, gw=gw, n_groups=n_groups)
    k, v = pl.pallas_call(
        kv_kernel,
        out_shape=(jax.ShapeDtypeStruct((B, n_groups, n_pad, gw), attn_dtype),
                   jax.ShapeDtypeStruct((B, n_groups, n_pad, gw), attn_dtype)),
        grid_spec=pltpu.PrefetchScalarGridSpec(
            num_scalar_prefetch=0,
            grid=grid,
            in_specs=[
                pl.BlockSpec((1, tile_n, C), lambda b, i: (b, i, 0)),    # x
                const_spec((C, 2 * C), lambda b, i: (0, 0)),             # w_kv
            ],
            out_specs=[
                pl.BlockSpec((1, n_groups, tile_n, gw),
                             lambda b, i: (b, 0, i, 0)),                 # K
                pl.BlockSpec((1, n_groups, tile_n, gw),
                             lambda b, i: (b, 0, i, 0)),                 # V
            ],
        ),
        compiler_params=compiler_params,
    )(x_p, w_kv)

    # --- Stage 2: fused Q proj + per-head attention + output projection -----
    attn_kernel = functools.partial(
        _attn_proj_kernel, num_heads=num_heads, heads_per_group=heads_per_group,
        scale=scale, n_valid=N, compute_dtype=attn_dtype,
        unroll_heads=(num_heads <= 8))

    out = pl.pallas_call(
        attn_kernel,
        out_shape=jax.ShapeDtypeStruct((B, n_pad, C), x.dtype),
        grid_spec=pltpu.PrefetchScalarGridSpec(
            num_scalar_prefetch=0,
            grid=grid,
            in_specs=[
                pl.BlockSpec((1, tile_n, C), lambda b, i: (b, i, 0)),    # x
                const_spec((C, C), lambda b, i: (0, 0)),                 # w_q
                const_spec((1, n_groups, n_pad, gw),
                           lambda b, i: (b, 0, 0, 0)),                   # K full
                const_spec((1, n_groups, n_pad, gw),
                           lambda b, i: (b, 0, 0, 0)),                   # V full
                const_spec((n_groups, gw, C), lambda b, i: (0, 0, 0)),   # w_proj
                const_spec((1, C), lambda b, i: (0, 0)),                 # b_proj
            ],
            out_specs=pl.BlockSpec((1, tile_n, C), lambda b, i: (b, i, 0)),
            scratch_shapes=[
                pltpu.VMEM((n_groups, tile_n, gw), attn_dtype),  # scaled Q
                pltpu.VMEM((tile_n, C), jnp.float32),            # proj accum
            ],
        ),
        compiler_params=compiler_params,
    )(x_p, w_q, k, v, w_proj_g, b_proj2d)

    return out[:, :N, :] if n_pad != N else out


# ---------------------------------------------------------------------------
# Pure-JAX reference mirroring the PyTorch forward exactly.
# ---------------------------------------------------------------------------
def _reference_attention(x, w_qkv, w_proj, b_proj, *, num_heads):
    B, N, C = x.shape
    Dh = C // num_heads
    scale = Dh ** (-0.5)
    qkv = jnp.einsum('bnc,cd->bnd', x, w_qkv)                     # (B, N, 3C)
    qkv = qkv.reshape(B, N, 3, num_heads, Dh).transpose(2, 0, 3, 1, 4)
    q, k, v = qkv[0], qkv[1], qkv[2]                              # (B, H, N, Dh)
    attn = jnp.einsum('bhnd,bhmd->bhnm', q, k) * scale
    attn = jax.nn.softmax(attn, axis=-1)
    out = jnp.einsum('bhnm,bhmd->bhnd', attn, v)
    out = out.transpose(0, 2, 1, 3).reshape(B, N, C)
    return jnp.einsum('bnc,cd->bnd', out, w_proj) + b_proj


if __name__ == "__main__":
    # --- Config 1: Dh=64 (head pairs, unrolled), multi-tile grid ------------
    B, N, C, H = 2, 128, 256, 4
    k0, k1, k2, k3 = jax.random.split(jax.random.PRNGKey(0), 4)
    x = jax.random.normal(k0, (B, N, C), dtype=jnp.float32)
    w_qkv = 0.02 * jax.random.normal(k1, (C, 3 * C), dtype=jnp.float32)
    w_proj = 0.02 * jax.random.normal(k2, (C, C), dtype=jnp.float32)
    b_proj = 0.02 * jax.random.normal(k3, (C,), dtype=jnp.float32)

    y = attention_forward(x, w_qkv, w_proj, b_proj, num_heads=H, q_tile=64)
    y = jax.block_until_ready(y)
    y_ref = _reference_attention(x, w_qkv, w_proj, b_proj, num_heads=H)
    # bf16 K/V/P inside the kernel + approx EUP reciprocal -> 2e-2 tolerance.
    assert jnp.allclose(y, y_ref, atol=2e-2, rtol=2e-2), "config1 f32 mismatch"

    xb, wqb = x.astype(jnp.bfloat16), w_qkv.astype(jnp.bfloat16)
    wpb, bpb = w_proj.astype(jnp.bfloat16), b_proj.astype(jnp.bfloat16)
    yb = attention_forward(xb, wqb, wpb, bpb, num_heads=H, q_tile=64)
    yb = jax.block_until_ready(yb)
    yb_ref = _reference_attention(xb.astype(jnp.float32), wqb.astype(jnp.float32),
                                  wpb.astype(jnp.float32), bpb.astype(jnp.float32),
                                  num_heads=H)
    assert jnp.allclose(yb.astype(jnp.float32), yb_ref,
                        atol=2e-2, rtol=2e-2), "config1 bf16 mismatch"

    # --- Config 2: N=192 (padding + key mask), H=12 (fori_loop head groups) -
    B2, N2, C2, H2 = 1, 192, 384, 12
    k4, k5, k6, k7 = jax.random.split(jax.random.PRNGKey(1), 4)
    x2 = jax.random.normal(k4, (B2, N2, C2), dtype=jnp.float32)
    w_qkv2 = 0.02 * jax.random.normal(k5, (C2, 3 * C2), dtype=jnp.float32)
    w_proj2 = 0.02 * jax.random.normal(k6, (C2, C2), dtype=jnp.float32)
    b_proj2 = 0.02 * jax.random.normal(k7, (C2,), dtype=jnp.float32)

    y2 = attention_forward(x2, w_qkv2, w_proj2, b_proj2, num_heads=H2,
                           q_tile=128)
    y2 = jax.block_until_ready(y2)
    y2_ref = _reference_attention(x2, w_qkv2, w_proj2, b_proj2, num_heads=H2)
    assert jnp.allclose(y2, y2_ref, atol=2e-2, rtol=2e-2), "config2 mismatch"

    print("KERNEL_OK")
</pallas_src>

<mosaic_0001>
module attributes {stable_mosaic.version = 11 : i64} {
  func.func @_probe(%arg0: i32, %arg1: memref<8x128xf32, #tpu.memory_space<vmem>>, %arg2: memref<8x128xf32, #tpu.memory_space<vmem>>) attributes {dimension_semantics = [#tpu.dimension_semantics<arbitrary>], iteration_bounds = array<i64: 2>, scalar_prefetch = 0 : i64, scratch_operands = 0 : i64, tpu.core_type = #tpu.core_type<tc>, window_params = [{pipeline_mode = #tpu.pipeline_mode<synchronous>, transform_indices = @transform_0, window_bounds = array<i64: 8, 128>}, {pipeline_mode = #tpu.pipeline_mode<synchronous>, transform_indices = @transform_1, window_bounds = array<i64: 8, 128>}]} {
    %c0 = arith.constant 0 : index
    %c0_0 = arith.constant 0 : index
    %0 = vector.load %arg1[%c0, %c0_0] : memref<8x128xf32, #tpu.memory_space<vmem>>, vector<8x128xf32>
    %cst = arith.constant 2.000000e+00 : f32
    %1 = vector.broadcast %cst : f32 to vector<8x128xf32>
    %2 = arith.mulf %0, %1 : vector<8x128xf32>
    %c0_1 = arith.constant 0 : index
    %c0_2 = arith.constant 0 : index
    %3 = vector.load %arg2[%c0_1, %c0_2] : memref<8x128xf32, #tpu.memory_space<vmem>>, vector<8x128xf32>
    tpu.vector_store %arg2[%c0_1, %c0_2], %2 {strides = array<i32>} : memref<8x128xf32, #tpu.memory_space<vmem>>, vector<8x128xf32>,
    return
  }
  func.func @transform_0(%arg0: i32) -> (i32, i32) {
    %c0_i32 = arith.constant 0 : i32
    %c0_i32_0 = arith.constant 0 : i32
    %c0_i32_1 = arith.constant 0 : i32
    return %c0_i32, %c0_i32_0 : i32, i32
  }
  func.func @transform_1(%arg0: i32) -> (i32, i32) {
    %c0_i32 = arith.constant 0 : i32
    %c0_i32_0 = arith.constant 0 : i32
    %c0_i32_1 = arith.constant 0 : i32
    return %c0_i32, %c0_i32_0 : i32, i32
  }
}

module attributes {stable_mosaic.version = 11 : i64} {
  func.func @_kv_proj_kernel(%arg0: i32, %arg1: i32, %arg2: memref<1x64x256xf32, #tpu.memory_space<vmem>>, %arg3: memref<256x512xf32, #tpu.memory_space<vmem>>, %arg4: memref<1x2x64x128xbf16, #tpu.memory_space<vmem>>, %arg5: memref<1x2x64x128xbf16, #tpu.memory_space<vmem>>) attributes {dimension_semantics = [#tpu.dimension_semantics<parallel>, #tpu.dimension_semantics<parallel>], iteration_bounds = array<i64: 2, 2>, scalar_prefetch = 0 : i64, scratch_operands = 0 : i64, tpu.core_type = #tpu.core_type<tc>, window_params = [{transform_indices = @transform_0, window_bounds = array<i64: 1, 64, 256>}, {pipeline_mode = #tpu.pipeline_mode<synchronous>, transform_indices = @transform_1, window_bounds = array<i64: 256, 512>}, {transform_indices = @transform_2, window_bounds = array<i64: 1, 2, 64, 128>}, {transform_indices = @transform_3, window_bounds = array<i64: 1, 2, 64, 128>}]} {
    %c0 = arith.constant 0 : index
    %c0_0 = arith.constant 0 : index
    %c0_1 = arith.constant 0 : index
    %0 = vector.load %arg2[%c0, %c0_0, %c0_1] : memref<1x64x256xf32, #tpu.memory_space<vmem>>, vector<1x64x256xf32>
    %1 = vector.shape_cast %0 : vector<1x64x256xf32> to vector<64x256xf32>
    %c0_2 = arith.constant 0 : index
    %c0_3 = arith.constant 0 : index
    %2 = vector.load %arg3[%c0_2, %c0_3] : memref<256x512xf32, #tpu.memory_space<vmem>>, vector<256x512xf32>
    %cst = arith.constant dense<0.000000e+00> : vector<64x512xf32>
    %3 = tpu.matmul %1, %2, %cst {dimension_numbers = #tpu.dot_dimension_numbers<[1], [0], [0], [1], [0, 0, 1, 1], [], []>} : vector<64x256xf32>, vector<256x512xf32>, vector<64x512xf32> -> vector<64x512xf32>
    %4 = vector.extract_strided_slice %3 {offsets = [0, 0], sizes = [64, 128], strides = [1, 1]} : vector<64x512xf32> to vector<64x128xf32>
    %5 = arith.truncf %4 : vector<64x128xf32> to vector<64x128xbf16>
    %c0_4 = arith.constant 0 : index
    %c0_5 = arith.constant 0 : index
    %c0_6 = arith.constant 0 : index
    %c0_7 = arith.constant 0 : index
    %6 = vector.load %arg4[%c0_4, %c0_5, %c0_6, %c0_7] : memref<1x2x64x128xbf16, #tpu.memory_space<vmem>>, vector<1x1x64x128xbf16>
    %7 = vector.shape_cast %6 : vector<1x1x64x128xbf16> to vector<64x128xbf16>
    %8 = vector.shape_cast %5 : vector<64x128xbf16> to vector<1x1x64x128xbf16>
    tpu.vector_store %arg4[%c0_4, %c0_5, %c0_6, %c0_7], %8 {strides = array<i32>} : memref<1x2x64x128xbf16, #tpu.memory_space<vmem>>, vector<1x1x64x128xbf16>,
    %9 = vector.extract_strided_slice %3 {offsets = [0, 256], sizes = [64, 128], strides = [1, 1]} : vector<64x512xf32> to vector<64x128xf32>
    %10 = arith.truncf %9 : vector<64x128xf32> to vector<64x128xbf16>
    %c0_8 = arith.constant 0 : index
    %c0_9 = arith.constant 0 : index
    %c0_10 = arith.constant 0 : index
    %c0_11 = arith.constant 0 : index
    %11 = vector.load %arg5[%c0_8, %c0_9, %c0_10, %c0_11] : memref<1x2x64x128xbf16, #tpu.memory_space<vmem>>, vector<1x1x64x128xbf16>
    %12 = vector.shape_cast %11 : vector<1x1x64x128xbf16> to vector<64x128xbf16>
    %13 = vector.shape_cast %10 : vector<64x128xbf16> to vector<1x1x64x128xbf16>
    tpu.vector_store %arg5[%c0_8, %c0_9, %c0_10, %c0_11], %13 {strides = array<i32>} : memref<1x2x64x128xbf16, #tpu.memory_space<vmem>>, vector<1x1x64x128xbf16>,
    %14 = vector.extract_strided_slice %3 {offsets = [0, 128], sizes = [64, 128], strides = [1, 1]} : vector<64x512xf32> to vector<64x128xf32>
    %15 = arith.truncf %14 : vector<64x128xf32> to vector<64x128xbf16>
    %c0_12 = arith.constant 0 : index
    %c1 = arith.constant 1 : index
    %c0_13 = arith.constant 0 : index
    %c0_14 = arith.constant 0 : index
    %16 = vector.load %arg4[%c0_12, %c1, %c0_13, %c0_14] : memref<1x2x64x128xbf16, #tpu.memory_space<vmem>>, vector<1x1x64x128xbf16>
    %17 = vector.shape_cast %16 : vector<1x1x64x128xbf16> to vector<64x128xbf16>
    %18 = vector.shape_cast %15 : vector<64x128xbf16> to vector<1x1x64x128xbf16>
    tpu.vector_store %arg4[%c0_12, %c1, %c0_13, %c0_14], %18 {strides = array<i32>} : memref<1x2x64x128xbf16, #tpu.memory_space<vmem>>, vector<1x1x64x128xbf16>,
    %19 = vector.extract_strided_slice %3 {offsets = [0, 384], sizes = [64, 128], strides = [1, 1]} : vector<64x512xf32> to vector<64x128xf32>
    %20 = arith.truncf %19 : vector<64x128xf32> to vector<64x128xbf16>
    %c0_15 = arith.constant 0 : index
    %c1_16 = arith.constant 1 : index
    %c0_17 = arith.constant 0 : index
    %c0_18 = arith.constant 0 : index
    %21 = vector.load %arg5[%c0_15, %c1_16, %c0_17, %c0_18] : memref<1x2x64x128xbf16, #tpu.memory_space<vmem>>, vector<1x1x64x128xbf16>
    %22 = vector.shape_cast %21 : vector<1x1x64x128xbf16> to vector<64x128xbf16>
    %23 = vector.shape_cast %20 : vector<64x128xbf16> to vector<1x1x64x128xbf16>
    tpu.vector_store %arg5[%c0_15, %c1_16, %c0_17, %c0_18], %23 {strides = array<i32>} : memref<1x2x64x128xbf16, #tpu.memory_space<vmem>>, vector<1x1x64x128xbf16>,
    return
  }
  func.func @transform_0(%arg0: i32, %arg1: i32) -> (i32, i32, i32) {
    %c0_i32 = arith.constant 0 : i32
    %c0_i32_0 = arith.constant 0 : i32
    return %arg0, %arg1, %c0_i32 : i32, i32, i32
  }
  func.func @transform_1(%arg0: i32, %arg1: i32) -> (i32, i32) {
    %c0_i32 = arith.constant 0 : i32
    %c0_i32_0 = arith.constant 0 : i32
    %c0_i32_1 = arith.constant 0 : i32
    return %c0_i32, %c0_i32_0 : i32, i32
  }
  func.func @transform_2(%arg0: i32, %arg1: i32) -> (i32, i32, i32, i32) {
    %c0_i32 = arith.constant 0 : i32
    %c0_i32_0 = arith.constant 0 : i32
    %c0_i32_1 = arith.constant 0 : i32
    return %arg0, %c0_i32, %arg1, %c0_i32_0 : i32, i32, i32, i32
  }
  func.func @transform_3(%arg0: i32, %arg1: i32) -> (i32, i32, i32, i32) {
    %c0_i32 = arith.constant 0 : i32
    %c0_i32_0 = arith.constant 0 : i32
    %c0_i32_1 = arith.constant 0 : i32
    return %arg0, %c0_i32, %arg1, %c0_i32_0 : i32, i32, i32, i32
  }
}

</mosaic_0001>

<bundles_post_ra>
// kernel: tpu_custom_call.1
= control target key start
LH: loop header
LB: loop body
LE: loop exit
PB: predicated region body
PF: predicated region fallthrough
CT: control target
= control target key end

     0   :  { %6 = vsyncpa [#allocation3], 0  ;;  %s341_s0 = inlined_call_operand.hbm [shape: f32[8,128], index: 0, kind: input, shape index: {}]   ;;  %s342_s1 = inlined_call_operand.hbm [shape: f32[8,128], index: 1, kind: output, shape index: {}]  }
   0x1   :  { %7 = vsyncpa [#allocation4], 0  ;;  %s262_s6 = smov 0  }
   0x2 LB: > { %s145_s7 = sadd.s32 4294967295, %s248_s6   ;;  %p146_p0 = scmp.ge.s32.totalorder %s248_s6, 1  ;;  %s248_s6 = sphi %s262_s6, %s13_s6  }
   0x3   : > { %p60_p1 = scmp.lt.s32.totalorder %s248_s6, 3  ;;  %p276_p3 = scmp.eq.s32.totalorder %s145_s7, 0 }
   0x4   : > { %s250_s10 = smov [#allocation2]   ;;  %s180_s15 = scalar_lea.hbm %s341_s0, 128 }
   0x5   : > { %p270_p2 = pnand %p146_p0, %p60_p1  ;;  %s73_s11 = sshll.u32 %s250_s10, 4  ;;  %s74_s11 = int_to_ptr.vmem [resolvable:$true] %s73_s11 }
   0x6   : > { %s347_s9 = scalar_select %p276_p3, 1, 0 }
   0x7   : > { %s346_s8 = scalar_select %p270_p2, 1, 0 }
   0x8   : > { %p162_p4 = pneg %p270_p2  ;;  %p181_p6 = scmp.ne.s32.totalorder %s341_s0, %s180_s15 }
   0x9   : > { %p187_p10 = scmp.lt.u32.totalorder %s180_s15, %s341_s0 }
   0xa   : > { %p284_p5 = pnand %p276_p3, %p162_p4 }
   0xc   : > { %p182_p7 = pneg %p284_p5 }
   0xe   : > { %p183_p8 = pnand %p182_p7, %p181_p6 }
  0x10   : > { %p184_p9 = pneg %p183_p8 }
  0x12   : > { %p189_p11 = pnand %p187_p10, %p184_p9 }
  0x14   : > { %192 = shalt.err (!%p189_p11)
}
  0x15   : > { %s193_s20 = scalar_lea.vmem %s74_s11, 128  ;;  %p201_p1 = scmp.lt.s32.totalorder %s74_s11, %s74_s11 }
  0x16   : > { %p194_p12 = scmp.ne.s32.totalorder %s74_s11, %s193_s20  ;;  %p202_p4 = scmp.lt.s32.totalorder %s193_s20, %s193_s20 }
  0x18   : > { %p196_p13 = pnand %p194_p12, %p182_p7  ;;  %p203_p3 = por %p202_p4, %p201_p1 }
  0x1a   : > { %p197_p0 = pneg %p196_p13 }
  0x1c   : > { %p204_p2 = pnand %p203_p3, %p197_p0 }
  0x1e   : > { %207 = shalt.err (!%p204_p2)
}
  0x1f   : > { %165 = dma.hbm_to_vmem [thread:$0]  (!%p284_p5), %s341_s0, 128, %s74_s11, [#allocation3]  }
  0x20   : > { %p349_p6 = scmp.ne.s32.totalorder %s346_s8, 0 }
  0x21   : > { %p350_p8 = scmp.ne.s32.totalorder (!%p349_p6), %s347_s9, 0 }
  0x22   : > { %86 = sbr.rel (%p349_p6) target bundleno = 67 (0x43), region = 24 }
  0x29   : > { %239 = dma.done.wait (%p350_p8), [#allocation3], 128  }
  0x2a   : > { %241 = vsyncadd (%p350_p8), [#allocation3], 4294967168  ;;  %s251_s23 = smov [#allocation5]   ;;  %v96_v0 = vld [vmem:[#allocation2] sm:$0xff]  ;;  %p312_p2 = scmp.eq.s32.totalorder %s145_s7, 1 }
  0x2b   : > { %s106_s24 = sshll.u32 %s251_s23, 4  ;;  %v97_v1 = vmul.f32 2.0, %v96_v0  ;;  %s107_s24 = int_to_ptr.vmem [resolvable:$true] %s106_s24 }
  0x2c   : > { %s208_s26 = scalar_lea.vmem %s107_s24, 128  ;;  %p215_p9 = scmp.lt.s32.totalorder %s107_s24, %s107_s24 }
  0x2d   : > { %98 = vst [vmem:[#allocation5] sm:$0xff] %v97_v1  ;;  %p209_p3 = scmp.ne.s32.totalorder %s107_s24, %s208_s26  ;;  %p216_p10 = scmp.lt.s32.totalorder %s208_s26, %s208_s26 }
  0x2f   : > { %p210_p5 = pnand %p209_p3, %p312_p2  ;;  %p217_p11 = por %p216_p10, %p215_p9 }
  0x31   : > { %p211_p7 = pneg %p210_p5 }
  0x33   : > { %p218_p12 = pnand %p217_p11, %p211_p7 }
  0x35   : > { %221 = shalt.err (!%p218_p12)
}
  0x36   : > { %s222_s29 = scalar_lea.hbm %s342_s1, 128 }
  0x37   : > { %p223_p13 = scmp.ne.s32.totalorder %s342_s1, %s222_s29  ;;  %p228_p4 = scmp.lt.u32.totalorder %s222_s29, %s342_s1 }
  0x39   : > { %p224_p0 = pnand %p223_p13, %p312_p2 }
  0x3b   : > { %p225_p1 = pneg %p224_p0 }
  0x3d   : > { %p230_p6 = pnand %p228_p4, %p225_p1 }
  0x3f   : > { %233 = shalt.err (!%p230_p6)
}
  0x40   : > { %159 = dma.vmem_to_hbm [thread:$0]  (%p312_p2), %s107_s24, 128, %s342_s1, [#allocation4]  }
  0x41   : > { %243 = dma.done.wait (%p312_p2), [#allocation4], 128  }
  0x42   : > { %245 = vsyncadd (%p312_p2), [#allocation4], 4294967168 }
  0x43 PF: > { %s13_s6 = sadd.s32 1, %s248_s6  }
  0x44   : > { %p10_p8 = scmp.ge.s32.totalorder %s13_s6, 4  }
  0x46   :  { %12 = sbr.rel (!%p10_p8) target bundleno = 2 (0x2), region = 53 }
  0x4d   :  { %119 = vsyncpa [#allocation3], 1 }
  0x4e   :  { %121 = vsyncpa [#allocation3 + $0x1], 1 }
  0x4f   :  { %122 = vsyncpa [#allocation4], 1 }
  0x50   :  { %124 = vsyncpa [#allocation4 + $0x1], 1 }

// kernel: tpu_custom_call.1
= control target key start
LH: loop header
LB: loop body
LE: loop exit
PB: predicated region body
PF: predicated region fallthrough
CT: control target
= control target key end

     0   :  { %s1924_s0 = inlined_call_operand.hbm [shape: f32[2,128,256], index: 0, kind: input, shape index: {}]   ;;  %s1925_s1 = inlined_call_operand.hbm [shape: f32[256,512], index: 1, kind: input, shape index: {}]   ;;  %s1926_s2 = inlined_call_operand.hbm [shape: bf16[2,2,128,128], index: 2, kind: output, shape index: {0}]   ;;  %s1927_s3 = inlined_call_operand.hbm [shape: bf16[2,2,128,128], index: 3, kind: output, shape index: {1}]  }
   0x1   :  { %1936 = sst [smem:[#allocation22_spill]] %s1925_s1 }
   0x2   :  { %9 = vsyncpa [#allocation3], 0 }
   0x3   :  { %11 = vsyncpa [#allocation3 + $0x1], 0 }
   0x4   :  { %12 = vsyncpa [#allocation6], 0 }
   0x5   :  { %13 = vsyncpa [#allocation4], 0 }
   0x6   :  { %15 = vsyncpa [#allocation4 + $0x1], 0 }
   0x7   :  { %16 = vsyncpa [#allocation9], 0 }
   0x8   :  { %18 = vsyncpa [#allocation9 + $0x1], 0  ;;  %s1633_s12 = smov 0   ;;  %s1635_s13 = smov 0  }
   0x9   :  { %s1637_s14 = smov 0   ;;  %s1639_s15 = smov 0  }
   0xa   :  { %s1641_s16 = smov 0   ;;  %s1643_s17 = smov 0  }
   0xb   :  { %s1645_s18 = smov 0   ;;  %s1647_s19 = smov 0  }
   0xc LB: > { %1937 = sst [smem:[#allocation18_spill]] %s1583_s17  ;;  %s1003_s20 = sadd.s32 4294967295, %s1591_s19   ;;  %s1591_s19 = sphi %s1647_s19, %s24_s19   ;;  %s1587_s18 = sphi %s1645_s18, %s1964_s18   ;;  %s1583_s17 = sphi %s1643_s17, %s1958_s17   ;;  %s1579_s16 = sphi %s1641_s16, %s1963_s16   ;;  %s1575_s15 = sphi %s1639_s15, %s1957_s15   ;;  %s1571_s14 = sphi %s1637_s14, %s1962_s14   ;;  %s1567_s13 = sphi %s1635_s13, %s1961_s13   ;;  %s1563_s12 = sphi %s1633_s12, %s1960_s12  }
   0xd   : > { %s1004_s21 = sadd.s32 4294967294, %s1591_s19   ;;  %p58_p0 = scmp.ne.s32.totalorder %s1567_s13, %s1563_s12 }
   0xe   : > { %p1677_p1 = scmp.eq.s32.totalorder %s1003_s20, 0  ;;  %p1681_p2 = scmp.eq.s32.totalorder %s1003_s20, 3 }
   0xf   : > { %p111_p3 = scmp.eq.s32.totalorder %s1004_s21, 3  ;;  %p1005_p5 = scmp.ge.s32.totalorder %s1591_s19, 1 }
  0x10   : > { %s1938_s22 = scalar_select %p1677_p1, 1, 0 }
  0x11   : > { %s1939_s23 = scalar_select %p1681_p2, 1, 0 }
  0x12   : > { %p1687_p4 = por %p1677_p1, %p58_p0  ;;  %p1692_p6 = por %p111_p3, %p58_p0 }
  0x13   : > { %p146_p7 = scmp.lt.s32.totalorder %s1591_s19, 5  ;;  %s1593_s27 = smov [#allocation5]  }
  0x14   : > { %s1940_s24 = scalar_select %p1687_p4, 1, 0 }
  0x15   : > { %s1941_s25 = scalar_select %p1692_p6, 1, 0 }
  0x16   : > { %p1697_p8 = pnand %p1005_p5, %p146_p7  ;;  %s158_s28 = sshll.u32 %s1593_s27, 4  ;;  %s159_s28 = int_to_ptr.vmem [resolvable:$true] %s158_s28 }
  0x17   : > { %1942 = sst [smem:[#allocation19_spill]] %s1941_s25  ;;  %s1945_s1 = sld [smem:[#allocation22_spill]] }
  0x18   : > { %s1943_s26 = scalar_select %p1697_p8, 1, 0 }
  0x19   : > { %p1353_p9 = pneg %p1697_p8 }
  0x1b   : > { %p1705_p10 = pnand %p1353_p9, %p1677_p1 }
  0x1d   : > { %s1455_s5 = scalar_lea.hbm %s1945_s1, 16384  ;;  %p1457_p12 = pneg %p1705_p10 }
  0x1e   : > { %p1456_p11 = scmp.ne.s32.totalorder %s1945_s1, %s1455_s5  ;;  %p1462_p3 = scmp.lt.u32.totalorder %s1455_s5, %s1945_s1 }
  0x20   : > { %p1458_p13 = pnand %p1457_p12, %p1456_p11 }
  0x22   : > { %p1459_p0 = pneg %p1458_p13 }
  0x24   : > { %p1464_p5 = pnand %p1462_p3, %p1459_p0 }
  0x26   : > { %1467 = shalt.err (!%p1464_p5)
}
  0x27   : > { %s1468_s10 = scalar_lea.vmem %s159_s28, 16384  ;;  %p1476_p1 = scmp.lt.s32.totalorder %s159_s28, %s159_s28 }
  0x28   : > { %p1469_p7 = scmp.ne.s32.totalorder %s159_s28, %s1468_s10  ;;  %p1477_p4 = scmp.lt.s32.totalorder %s1468_s10, %s1468_s10 }
  0x2a   : > { %p1471_p9 = pnand %p1469_p7, %p1457_p12  ;;  %p1478_p8 = por %p1477_p4, %p1476_p1 }
  0x2c   : > { %p1472_p6 = pneg %p1471_p9 }
  0x2e   : > { %p1479_p2 = pnand %p1478_p8, %p1472_p6 }
  0x30   : > { %1482 = shalt.err (!%p1479_p2)
}
  0x31   : > { %s1594_s11 = smov 512   ;;  %s1595_s20 = smov 32  }
  0x32   : > { %1356 = dma.hbm_to_vmem [thread:$0]  (!%p1705_p10), %s1945_s1, 16384, %s159_s28, [#allocation6], %s1594_s11, %s1594_s11, %s1595_s20  }
  0x33   : > { %s33_s30 = sadd.s32 1, %s1583_s17  ;;  %s36_s4 = sadd.s32 1, %s1587_s18 }
  0x34   : > { %p34_p1 = scmp.ge.s32.totalorder %s33_s30, 2  ;;  %s45_s5 = sadd.s32 1, %s1571_s14 }
  0x35   : > { %p52_p2 = scmp.ne.s32.totalorder %s1571_s14, %s1567_s13  ;;  %p53_p4 = scmp.eq.s32.totalorder %s1591_s19, 0 }
  0x36   : > { %s1966_s30 = smov (%p34_p1, %s33_s30), 0  ;;  %s1968_s4 = smov (!%p34_p1, %s36_s4), %s1587_s18 }
  0x37   : > { %1946 = sst [smem:[#allocation20_spill]] %s1966_s30  ;;  %s41_s6 = ssub.s32 %s1583_s17, %s1966_s30 }
  0x38   : > { %p38_p6 = scmp.ge.s32.totalorder %s1968_s4, 2  ;;  %p1947_p8 = scmp.ne.s32.totalorder %s1939_s23, 0 }
  0x39   : > { %p1742_p10 = por %p53_p4, %p52_p2  ;;  %p1369_p12 = scmp.lt.s32.totalorder %s1591_s19, 4 }
  0x3a   : > { %p1738_p11 = por %p1947_p8, %p52_p2  ;;  %s1970_s4 = smov (%p38_p6, %s1968_s4), 0 }
  0x3b   : > { %1950 = sst [smem:[#allocation21_spill]] %s1970_s4  ;;  %s172_s7 = sand.u32 1, %s1571_s14  }
  0x3c   : > { %s1076_s8 = sshll.u32 %s1583_s17, 4  ;;  %s40_s9 = ssub.s32 %s1587_s18, %s1970_s4 }
  0x3d   : > { %s42_s10 = sor.u32 %s41_s6, %s40_s9  ;;  %s1008_s11 = sshll.u32 %s172_s7, 7 }
  0x3e   : > { %p43_p13 = scmp.eq.s32.totalorder %s42_s10, 0  ;;  %s1011_s23 = sshll.u32 %s1587_s18, 5 }
  0x3f   : > { %s176_s20 = scalar_lea.vmem [#allocation2], %s1008_s11  ;;  %s183_s1 = sadd.s32 %s1076_s8, %s1011_s23 }
  0x40   : > { %s186_s21 = sshll.u32 %s176_s20, 4  ;;  %s1012_s30 = sshll.u32 %s183_s1, 7  ;;  %s1757_s21 = int_to_ptr.vmem [resolvable:$true] %s186_s21 }
  0x41   : > { %s1755_s27 = scalar_select %p43_p13, %s1571_s14, %s45_s5  }
  0x42   : > { %p1763_p0 = pnand %p1369_p12, %p1742_p10  ;;  %s1770_s6 = scalar_lea.hbm %s1924_s0, %s1012_s30 }
  0x43   : > { %s1772_s5 = scalar_lea.sflag [#allocation3], %s172_s7  ;;  %s1483_s1 = scalar_lea.hbm %s1770_s6, 2048 }
  0x44   : > { %p1484_p3 = scmp.ne.s32.totalorder %s1770_s6, %s1483_s1  ;;  %p1485_p5 = pneg %p1763_p0 }
  0x45   : > { %s1488_s4 = scalar_lea.hbm %s1924_s0, 8192  ;;  %p1489_p1 = scmp.lt.u32.totalorder %s1770_s6, %s1924_s0 }
  0x46   : > { %p1486_p7 = pnand %p1485_p5, %p1484_p3  ;;  %p1490_p2 = scmp.lt.u32.totalorder %s1488_s4, %s1483_s1 }
  0x47   : > { %p1492_p6 = scmp.lt.u32.totalorder %s1483_s1, %s1770_s6 }
  0x48   : > { %p1487_p9 = pneg %p1486_p7  ;;  %p1491_p4 = por %p1490_p2, %p1489_p1 }
  0x4a   : > { %p1493_p8 = por %p1492_p6, %p1491_p4 }
  0x4c   : > { %p1494_p10 = pnand %p1493_p8, %p1487_p9 }
  0x4e   : > { %1497 = shalt.err (!%p1494_p10)
}
  0x4f   : > { %s1498_s7 = scalar_lea.vmem %s1757_s21, 2048  ;;  %s1596_s9 = smov [#allocation2]  }
  0x50   : > { %p1499_p12 = scmp.ne.s32.totalorder %s1757_s21, %s1498_s7  ;;  %s1503_s10 = sshll.u32 %s1596_s9, 4  ;;  %s1504_s10 = int_to_ptr.vmem [resolvable:$false] %s1503_s10 }
  0x51   : > { %s1505_s11 = scalar_lea.vmem %s1504_s10, 4096  ;;  %p1506_p7 = scmp.lt.s32.totalorder %s1757_s21, %s1504_s10 }
  0x52   : > { %p1501_p13 = pnand %p1499_p12, %p1485_p5  ;;  %p1507_p1 = scmp.lt.s32.totalorder %s1505_s11, %s1498_s7 }
  0x54   : > { %p1502_p3 = pneg %p1501_p13  ;;  %p1508_p2 = por %p1507_p1, %p1506_p7 }
  0x56   : > { %p1509_p4 = pnand %p1508_p2, %p1502_p3 }
  0x58   : > { %1512 = shalt.err (!%p1509_p4)
}
  0x59   : > { %s1597_s23 = smov 256   ;;  %s1598_s20 = smov 16  }
  0x5a   : > { %1360 = dma.hbm_to_vmem [thread:$0]  (!%p1763_p0), %s1770_s6, 2048, %s1757_s21, %s1772_s5, %s1597_s23, %s1597_s23, %s1598_s20  }
  0x5b   : > { %p1952_p5 = scmp.ne.s32.totalorder %s1943_s26, 0 }
  0x5c   : > { %s1803_s1 = sand.u32 (!%p1952_p5), 1, %s1567_s13   ;;  %p1953_p9 = scmp.ne.s32.totalorder (!%p1952_p5), %s1940_s24, 0 }
  0x5d   : > { %198 = sbr.rel (%p1952_p5) target bundleno = 437 (0x1b5), region = 28  ;;  %s1014_s28 = sshll.u32 (!%p1952_p5), %s1803_s1, 7 }
  0x5e   : > { %s201_s17 = scalar_lea.sflag (!%p1952_p5), [#allocation3], %s1803_s1  ;;  %s1807_s4 = scalar_lea.vmem (!%p1952_p5), [#allocation2], %s1014_s28 }
  0x64   : > { %1546 = dma.done.wait (%p1953_p9), %s201_s17, 2048  }
  0x65   : > { %1548 = vsyncadd (%p1953_p9), %s201_s17, 4294965248  ;;  %p1954_p0 = scmp.ne.s32.totalorder %s1938_s22, 0 }
  0x67   : > { %1550 = dma.done.wait (%p1954_p0), [#allocation6], 16384  }
  0x68   : > { %1552 = vsyncadd (%p1954_p0), [#allocation6], 4294950912  ;;  %v256_v0 = vld [vmem:[#allocation5 + $0x8] sm:$0xff]  ;;  %v258_v2 = vld [vmem:[#allocation5 + $0x18] sm:$0xff]  ;;  %s1016_s22 = sshll.u32 %s1803_s1, 6  ;;  %s772_s26 = scalar_lea.sflag [#allocation4], %s1803_s1 }
  0x69   : > { %v260_v1 = vld [vmem:[#allocation5 + $0x28] sm:$0xff]  ;;  %v262_v4 = vld [vmem:[#allocation5 + $0x38] sm:$0xff]  ;;  %v255_v5 = vld [vmem:[#allocation5] sm:$0xff]  ;;  %s1834_s24 = scalar_lea.vmem [#allocation7], %s1016_s22  ;;  %s1837_s25 = scalar_lea.vmem [#allocation8], %s1016_s22 }
  0x6a   : > { %v1203_v3 = vpack.c.bf16 %v260_v1, %v256_v0  ;;  %v259_v6 = vld [vmem:[#allocation5 + $0x20] sm:$0xff]  ;;  %v1267_v7 = vpack.c.bf16 %v262_v4, %v258_v2  ;;  %v257_v9 = vld [vmem:[#allocation5 + $0x10] sm:$0xff]  ;;  %v264_v11 = vld [vmem:[#allocation5 + $0x48] sm:$0xff]  ;;  %s777_s21 = scalar_lea.sflag [#allocation9], %s1803_s1 }
  0x6b   : > { %v1205_v8 = vpack.c.bf16 %v259_v6, %v255_v5  ;;  %v261_v10 = vld [vmem:[#allocation5 + $0x30] sm:$0xff]  ;;  %v268_v13 = vld [vmem:[#allocation5 + $0x68] sm:$0xff]  ;;  %v266_v14 = vld [vmem:[#allocation5 + $0x58] sm:$0xff] }
  0x6c   : > { %1204 = vmatprep.subr.bf16.mxu0 %v1203_v3  ;;  %v1269_v12 = vpack.c.bf16 %v261_v10, %v257_v9  ;;  %v270_v15 = vld [vmem:[#allocation5 + $0x78] sm:$0xff]  ;;  %1268 = vmatprep.subr.bf16.mxu1 %v1267_v7  ;;  %v1207_v16 = vpack.c.bf16 %v268_v13, %v264_v11  ;;  %v263_v18 = vld [vmem:[#allocation5 + $0x40] sm:$0xff]  ;;  %v265_v20 = vld [vmem:[#allocation5 + $0x50] sm:$0xff] }
  0x6d   : > { %1206 = vmatpush1.bf16.msra.mxu0 %v1205_v8  ;;  %v1271_v17 = vpack.c.bf16 %v270_v15, %v266_v14  ;;  %v267_v19 = vld [vmem:[#allocation5 + $0x60] sm:$0xff]  ;;  %v269_v22 = vld [vmem:[#allocation5 + $0x70] sm:$0xff]  ;;  %v272_v23 = vld [vmem:[#allocation5 + $0x88] sm:$0xff] }
  0x6e   : > { %1270 = vmatpush1.bf16.msra.mxu1 %v1269_v12  ;;  %v1209_v21 = vpack.c.bf16 %v267_v19, %v263_v18  ;;  %v276_v24 = vld [vmem:[#allocation5 + $0xa8] sm:$0xff]  ;;  %1208 = vmatprep.subr.bf16.mxu0 %v1207_v16  ;;  %v1273_v25 = vpack.c.bf16 %v269_v22, %v265_v20  ;;  %v274_v27 = vld [vmem:[#allocation5 + $0x98] sm:$0xff]  ;;  %v271_v29 = vld [vmem:[#allocation5 + $0x80] sm:$0xff] }
  0x6f   : > { %1272 = vmatprep.subr.bf16.mxu1 %v1271_v17  ;;  %v1211_v26 = vpack.c.bf16 %v276_v24, %v272_v23  ;;  %v278_v28 = vld [vmem:[#allocation5 + $0xb8] sm:$0xff]  ;;  %v275_v31 = vld [vmem:[#allocation5 + $0xa0] sm:$0xff]  ;;  %v273_v32 = vld [vmem:[#allocation5 + $0x90] sm:$0xff] }
  0x70   : > { %v1275_v30 = vpack.c.bf16 %v278_v28, %v274_v27  ;;  %v277_v33 = vld [vmem:[#allocation5 + $0xb0] sm:$0xff]  ;;  %v1213_v34 = vpack.c.bf16 %v275_v31, %v271_v29  ;;  %v280_v35 = vld [vmem:[#allocation5 + $0xc8] sm:$0xff]  ;;  %v282_v37 = vld [vmem:[#allocation5 + $0xd8] sm:$0xff] }
  0x71   : > { %1210 = vmatpush1.bf16.msra.mxu0 %v1209_v21  ;;  %v284_v36 = vld [vmem:[#allocation5 + $0xe8] sm:$0xff]  ;;  %v1277_v38 = vpack.c.bf16 %v277_v33, %v273_v32  ;;  %v286_v40 = vld [vmem:[#allocation5 + $0xf8] sm:$0xff]  ;;  %v279_v41 = vld [vmem:[#allocation5 + $0xc0] sm:$0xff] }
  0x72   : > { %1274 = vmatpush1.bf16.msra.mxu1 %v1273_v25  ;;  %1212 = vmatprep.subr.bf16.mxu0 %v1211_v26  ;;  %v1215_v39 = vpack.c.bf16 %v284_v36, %v280_v35  ;;  %v283_v42 = vld [vmem:[#allocation5 + $0xe0] sm:$0xff]  ;;  %v1279_v43 = vpack.c.bf16 %v286_v40, %v282_v37  ;;  %v281_v44 = vld [vmem:[#allocation5 + $0xd0] sm:$0xff]  ;;  %v288_v46 = vld [vmem:[#allocation5 + $0x108] sm:$0xff] }
  0x73   : > { %1276 = vmatprep.subr.bf16.mxu1 %v1275_v30  ;;  %v285_v45 = vld [vmem:[#allocation5 + $0xf0] sm:$0xff]  ;;  %v292_v47 = vld [vmem:[#allocation5 + $0x128] sm:$0xff]  ;;  %v290_v48 = vld [vmem:[#allocation5 + $0x118] sm:$0xff]  ;;  %v1217_v50 = vpack.c.bf16 %v283_v42, %v279_v41 }
  0x74   : > { %v294_v49 = vld [vmem:[#allocation5 + $0x138] sm:$0xff]  ;;  %v1281_v51 = vpack.c.bf16 %v285_v45, %v281_v44  ;;  %v1219_v52 = vpack.c.bf16 %v292_v47, %v288_v46  ;;  %v287_v53 = vld [vmem:[#allocation5 + $0x100] sm:$0xff]  ;;  %v289_v55 = vld [vmem:[#allocation5 + $0x110] sm:$0xff] }
  0x75   : > { %1214 = vmatpush1.bf16.msra.mxu0 %v1213_v34  ;;  %v291_v54 = vld [vmem:[#allocation5 + $0x120] sm:$0xff]  ;;  %v1283_v56 = vpack.c.bf16 %v294_v49, %v290_v48  ;;  %v293_v57 = vld [vmem:[#allocation5 + $0x130] sm:$0xff]  ;;  %v296_v58 = vld [vmem:[#allocation5 + $0x148] sm:$0xff] }
  0x76   : > { %1278 = vmatpush1.bf16.msra.mxu1 %v1277_v38  ;;  %1216 = vmatprep.subr.bf16.mxu0 %v1215_v39  ;;  %v300_v59 = vld [vmem:[#allocation5 + $0x168] sm:$0xff]  ;;  %v298_v60 = vld [vmem:[#allocation5 + $0x158] sm:$0xff]  ;;  %v1221_v62 = vpack.c.bf16 %v291_v54, %v287_v53  ;;  %v1285_v63 = vpack.c.bf16 %v293_v57, %v289_v55  ;;  %v295_v1 = vld [vmem:[#allocation5 + $0x140] sm:$0xff] }
  0x77   : > { %1280 = vmatprep.subr.bf16.mxu1 %v1279_v43  ;;  %v302_v61 = vld [vmem:[#allocation5 + $0x178] sm:$0xff]  ;;  %v1223_v0 = vpack.c.bf16 %v300_v59, %v296_v58  ;;  %v299_v2 = vld [vmem:[#allocation5 + $0x160] sm:$0xff]  ;;  %v297_v3 = vld [vmem:[#allocation5 + $0x150] sm:$0xff] }
  0x78   : > { %v1287_v4 = vpack.c.bf16 %v302_v61, %v298_v60  ;;  %v301_v5 = vld [vmem:[#allocation5 + $0x170] sm:$0xff]  ;;  %v304_v6 = vld [vmem:[#allocation5 + $0x188] sm:$0xff]  ;;  %v306_v8 = vld [vmem:[#allocation5 + $0x198] sm:$0xff]  ;;  %v1225_v10 = vpack.c.bf16 %v299_v2, %v295_v1 }
  0x79   : > { %1218 = vmatpush1.bf16.msra.mxu0 %v1217_v50  ;;  %v308_v7 = vld [vmem:[#allocation5 + $0x1a8] sm:$0xff]  ;;  %v310_v9 = vld [vmem:[#allocation5 + $0x1b8] sm:$0xff]  ;;  %v1289_v11 = vpack.c.bf16 %v301_v5, %v297_v3  ;;  %v303_v13 = vld [vmem:[#allocation5 + $0x180] sm:$0xff] }
  0x7a   : > { %1282 = vmatpush1.bf16.msra.mxu1 %v1281_v51  ;;  %1220 = vmatprep.subr.bf16.mxu0 %v1219_v52  ;;  %v1227_v12 = vpack.c.bf16 %v308_v7, %v304_v6  ;;  %v307_v14 = vld [vmem:[#allocation5 + $0x1a0] sm:$0xff]  ;;  %v305_v15 = vld [vmem:[#allocation5 + $0x190] sm:$0xff]  ;;  %v1291_v16 = vpack.c.bf16 %v310_v9, %v306_v8  ;;  %v312_v18 = vld [vmem:[#allocation5 + $0x1c8] sm:$0xff] }
  0x7b   : > { %1284 = vmatprep.subr.bf16.mxu1 %v1283_v56  ;;  %v309_v17 = vld [vmem:[#allocation5 + $0x1b0] sm:$0xff]  ;;  %v316_v19 = vld [vmem:[#allocation5 + $0x1e8] sm:$0xff]  ;;  %v314_v20 = vld [vmem:[#allocation5 + $0x1d8] sm:$0xff]  ;;  %v1229_v22 = vpack.c.bf16 %v307_v14, %v303_v13 }
  0x7c   : > { %v318_v21 = vld [vmem:[#allocation5 + $0x1f8] sm:$0xff]  ;;  %v1293_v23 = vpack.c.bf16 %v309_v17, %v305_v15  ;;  %v1231_v24 = vpack.c.bf16 %v316_v19, %v312_v18  ;;  %v311_v25 = vld [vmem:[#allocation5 + $0x1c0] sm:$0xff]  ;;  %v313_v27 = vld [vmem:[#allocation5 + $0x1d0] sm:$0xff] }
  0x7d   : > { %1222 = vmatpush1.bf16.msra.mxu0 %v1221_v62  ;;  %v315_v26 = vld [vmem:[#allocation5 + $0x1e0] sm:$0xff]  ;;  %v1295_v28 = vpack.c.bf16 %v318_v21, %v314_v20  ;;  %v317_v29 = vld [vmem:[#allocation5 + $0x1f0] sm:$0xff]  ;;  %v320_v30 = vld [vmem:[#allocation5 + $0x208] sm:$0xff] }
  0x7e   : > { %1286 = vmatpush1.bf16.msra.mxu1 %v1285_v63  ;;  %1224 = vmatprep.subr.bf16.mxu0 %v1223_v0  ;;  %v324_v31 = vld [vmem:[#allocation5 + $0x228] sm:$0xff]  ;;  %v322_v32 = vld [vmem:[#allocation5 + $0x218] sm:$0xff]  ;;  %v1233_v34 = vpack.c.bf16 %v315_v26, %v311_v25  ;;  %v1297_v35 = vpack.c.bf16 %v317_v29, %v313_v27  ;;  %v319_v37 = vld [vmem:[#allocation5 + $0x200] sm:$0xff] }
  0x7f   : > { %1288 = vmatprep.subr.bf16.mxu1 %v1287_v4  ;;  %v326_v33 = vld [vmem:[#allocation5 + $0x238] sm:$0xff]  ;;  %v1235_v36 = vpack.c.bf16 %v324_v31, %v320_v30  ;;  %v323_v38 = vld [vmem:[#allocation5 + $0x220] sm:$0xff]  ;;  %v321_v39 = vld [vmem:[#allocation5 + $0x210] sm:$0xff] }
  0x80   : > { %v1299_v40 = vpack.c.bf16 %v326_v33, %v322_v32  ;;  %v325_v41 = vld [vmem:[#allocation5 + $0x230] sm:$0xff]  ;;  %v328_v42 = vld [vmem:[#allocation5 + $0x248] sm:$0xff]  ;;  %v330_v44 = vld [vmem:[#allocation5 + $0x258] sm:$0xff]  ;;  %v1237_v46 = vpack.c.bf16 %v323_v38, %v319_v37 }
  0x81   : > { %1226 = vmatpush1.bf16.msra.mxu0 %v1225_v10  ;;  %v332_v43 = vld [vmem:[#allocation5 + $0x268] sm:$0xff]  ;;  %v334_v45 = vld [vmem:[#allocation5 + $0x278] sm:$0xff]  ;;  %v1301_v47 = vpack.c.bf16 %v325_v41, %v321_v39  ;;  %v327_v49 = vld [vmem:[#allocation5 + $0x240] sm:$0xff] }
  0x82   : > { %1290 = vmatpush1.bf16.msra.mxu1 %v1289_v11  ;;  %1228 = vmatprep.subr.bf16.mxu0 %v1227_v12  ;;  %v1239_v48 = vpack.c.bf16 %v332_v43, %v328_v42  ;;  %v331_v50 = vld [vmem:[#allocation5 + $0x260] sm:$0xff]  ;;  %v329_v51 = vld [vmem:[#allocation5 + $0x250] sm:$0xff]  ;;  %v1303_v52 = vpack.c.bf16 %v334_v45, %v330_v44  ;;  %v336_v54 = vld [vmem:[#allocation5 + $0x288] sm:$0xff] }
  0x83   : > { %1292 = vmatprep.subr.bf16.mxu1 %v1291_v16  ;;  %v333_v53 = vld [vmem:[#allocation5 + $0x270] sm:$0xff]  ;;  %v340_v55 = vld [vmem:[#allocation5 + $0x2a8] sm:$0xff]  ;;  %v338_v56 = vld [vmem:[#allocation5 + $0x298] sm:$0xff]  ;;  %v1241_v58 = vpack.c.bf16 %v331_v50, %v327_v49 }
  0x84   : > { %v342_v57 = vld [vmem:[#allocation5 + $0x2b8] sm:$0xff]  ;;  %v1305_v59 = vpack.c.bf16 %v333_v53, %v329_v51  ;;  %v1243_v60 = vpack.c.bf16 %v340_v55, %v336_v54  ;;  %v335_v61 = vld [vmem:[#allocation5 + $0x280] sm:$0xff]  ;;  %v337_v63 = vld [vmem:[#allocation5 + $0x290] sm:$0xff] }
  0x85   : > { %1230 = vmatpush1.bf16.msra.mxu0 %v1229_v22  ;;  %v339_v62 = vld [vmem:[#allocation5 + $0x2a0] sm:$0xff]  ;;  %v1307_v0 = vpack.c.bf16 %v342_v57, %v338_v56  ;;  %v341_v1 = vld [vmem:[#allocation5 + $0x2b0] sm:$0xff]  ;;  %v344_v2 = vld [vmem:[#allocation5 + $0x2c8] sm:$0xff] }
  0x86   : > { %1294 = vmatpush1.bf16.msra.mxu1 %v1293_v23  ;;  %1232 = vmatprep.subr.bf16.mxu0 %v1231_v24  ;;  %v348_v3 = vld [vmem:[#allocation5 + $0x2e8] sm:$0xff]  ;;  %v346_v4 = vld [vmem:[#allocation5 + $0x2d8] sm:$0xff]  ;;  %v1245_v6 = vpack.c.bf16 %v339_v62, %v335_v61  ;;  %v343_v7 = vld [vmem:[#allocation5 + $0x2c0] sm:$0xff]  ;;  %v1309_v8 = vpack.c.bf16 %v341_v1, %v337_v63 }
  0x87   : > { %1296 = vmatprep.subr.bf16.mxu1 %v1295_v28  ;;  %v350_v5 = vld [vmem:[#allocation5 + $0x2f8] sm:$0xff]  ;;  %v1247_v9 = vpack.c.bf16 %v348_v3, %v344_v2  ;;  %v347_v10 = vld [vmem:[#allocation5 + $0x2e0] sm:$0xff]  ;;  %v345_v11 = vld [vmem:[#allocation5 + $0x2d0] sm:$0xff] }
  0x88   : > { %v349_v12 = vld [vmem:[#allocation5 + $0x2f0] sm:$0xff]  ;;  %v1311_v13 = vpack.c.bf16 %v350_v5, %v346_v4  ;;  %v352_v14 = vld [vmem:[#allocation5 + $0x308] sm:$0xff]  ;;  %v354_v17 = vld [vmem:[#allocation5 + $0x318] sm:$0xff]  ;;  %v1249_v19 = vpack.c.bf16 %v347_v10, %v343_v7 }
  0x89   : > { %1234 = vmatpush1.bf16.msra.mxu0 %v1233_v34  ;;  %v356_v15 = vld [vmem:[#allocation5 + $0x328] sm:$0xff]  ;;  %v358_v18 = vld [vmem:[#allocation5 + $0x338] sm:$0xff]  ;;  %v1313_v20 = vpack.c.bf16 %v349_v12, %v345_v11  ;;  %v351_v22 = vld [vmem:[#allocation5 + $0x300] sm:$0xff] }
  0x8a   : > { %1298 = vmatpush1.bf16.msra.mxu1 %v1297_v35  ;;  %1236 = vmatprep.subr.bf16.mxu0 %v1235_v36  ;;  %v240_v16 = vld [vmem:[%s1807_s4 + $0x8] sm:$0xff]  ;;  %v1251_v21 = vpack.c.bf16 %v356_v15, %v352_v14  ;;  %v355_v23 = vld [vmem:[#allocation5 + $0x320] sm:$0xff]  ;;  %v353_v24 = vld [vmem:[#allocation5 + $0x310] sm:$0xff]  ;;  %v1315_v25 = vpack.c.bf16 %v358_v18, %v354_v17 }
  0x8b   : > { %1300 = vmatprep.subr.bf16.mxu1 %v1299_v40  ;;  %447 = vmatprep.mubr.f32.mxu0 %v240_v16  ;;  %v357_v26 = vld [vmem:[#allocation5 + $0x330] sm:$0xff]  ;;  %v360_v27 = vld [vmem:[#allocation5 + $0x348] sm:$0xff]  ;;  %v362_v29 = vld [vmem:[#allocation5 + $0x358] sm:$0xff]  ;;  %v1253_v31 = vpack.c.bf16 %v355_v23, %v351_v22 }
  0x8c   : > { %560 = vmatprep.mubr.f32.mxu1 %v240_v16  ;;  %v364_v28 = vld [vmem:[#allocation5 + $0x368] sm:$0xff]  ;;  %v366_v30 = vld [vmem:[#allocation5 + $0x378] sm:$0xff]  ;;  %v1317_v32 = vpack.c.bf16 %v357_v26, %v353_v24  ;;  %v359_v34 = vld [vmem:[#allocation5 + $0x340] sm:$0xff] }
  0x8d   : > { %1238 = vmatpush1.bf16.msra.mxu0 %v1237_v46  ;;  %v1255_v33 = vpack.c.bf16 %v364_v28, %v360_v27  ;;  %v363_v35 = vld [vmem:[#allocation5 + $0x360] sm:$0xff]  ;;  %v361_v36 = vld [vmem:[#allocation5 + $0x350] sm:$0xff]  ;;  %v1319_v37 = vpack.c.bf16 %v366_v30, %v362_v29  ;;  %v368_v39 = vld [vmem:[#allocation5 + $0x388] sm:$0xff] }
  0x8e   : > { %1302 = vmatpush1.bf16.msra.mxu1 %v1301_v47  ;;  %1240 = vmatprep.subr.bf16.mxu0 %v1239_v48  ;;  %v365_v38 = vld [vmem:[#allocation5 + $0x370] sm:$0xff]  ;;  %v372_v40 = vld [vmem:[#allocation5 + $0x3a8] sm:$0xff]  ;;  %v370_v41 = vld [vmem:[#allocation5 + $0x398] sm:$0xff]  ;;  %v1257_v43 = vpack.c.bf16 %v363_v35, %v359_v34 }
  0x8f   : > { %1304 = vmatprep.subr.bf16.mxu1 %v1303_v52  ;;  %v374_v42 = vld [vmem:[#allocation5 + $0x3b8] sm:$0xff]  ;;  %v1321_v44 = vpack.c.bf16 %v365_v38, %v361_v36  ;;  %v1259_v45 = vpack.c.bf16 %v372_v40, %v368_v39  ;;  %v367_v46 = vld [vmem:[#allocation5 + $0x380] sm:$0xff]  ;;  %v369_v48 = vld [vmem:[#allocation5 + $0x390] sm:$0xff] }
  0x90   : > { %v371_v47 = vld [vmem:[#allocation5 + $0x3a0] sm:$0xff]  ;;  %v1323_v49 = vpack.c.bf16 %v374_v42, %v370_v41  ;;  %v373_v50 = vld [vmem:[#allocation5 + $0x3b0] sm:$0xff]  ;;  %v376_v51 = vld [vmem:[#allocation5 + $0x3c8] sm:$0xff] }
  0x91   : > { %1242 = vmatpush1.bf16.msra.mxu0 %v1241_v58  ;;  %v380_v52 = vld [vmem:[#allocation5 + $0x3e8] sm:$0xff]  ;;  %v378_v53 = vld [vmem:[#allocation5 + $0x3d8] sm:$0xff]  ;;  %v1261_v55 = vpack.c.bf16 %v371_v47, %v367_v46  ;;  %v1325_v56 = vpack.c.bf16 %v373_v50, %v369_v48  ;;  %v375_v58 = vld [vmem:[#allocation5 + $0x3c0] sm:$0xff] }
  0x92   : > { %1306 = vmatpush1.bf16.msra.mxu1 %v1305_v59  ;;  %1244 = vmatprep.subr.bf16.mxu0 %v1243_v60  ;;  %v382_v54 = vld [vmem:[#allocation5 + $0x3f8] sm:$0xff]  ;;  %v1263_v57 = vpack.c.bf16 %v380_v52, %v376_v51  ;;  %v379_v59 = vld [vmem:[#allocation5 + $0x3e0] sm:$0xff]  ;;  %v377_v61 = vld [vmem:[#allocation5 + $0x3d0] sm:$0xff] }
  0x93   : > { %1308 = vmatprep.subr.bf16.mxu1 %v1307_v0  ;;  %v1327_v60 = vpack.c.bf16 %v382_v54, %v378_v53  ;;  %v381_v62 = vld [vmem:[#allocation5 + $0x3f0] sm:$0xff]  ;;  %v1265_v63 = vpack.c.bf16 %v379_v59, %v375_v58  ;;  %v239_v1 = vld [vmem:[%s1807_s4] sm:$0xff]  ;;  %v242_v2 = vld [vmem:[%s1807_s4 + $0x18] sm:$0xff] }
  0x94   : > { %v1329_v0 = vpack.c.bf16 %v381_v62, %v377_v61  ;;  %v241_v3 = vld [vmem:[%s1807_s4 + $0x10] sm:$0xff]  ;;  %v244_v4 = vld [vmem:[%s1807_s4 + $0x28] sm:$0xff]  ;;  %v243_v5 = vld [vmem:[%s1807_s4 + $0x20] sm:$0xff] }
  0x95   : > { %1246 = vmatpush1.bf16.msra.mxu0 %v1245_v6  ;;  %v246_v6 = vld [vmem:[%s1807_s4 + $0x38] sm:$0xff]  ;;  %v245_v7 = vld [vmem:[%s1807_s4 + $0x30] sm:$0xff]  ;;  %v252_v12 = vld [vmem:[%s1807_s4 + $0x68] sm:$0xff] }
  0x96   : > { %1310 = vmatpush1.bf16.msra.mxu1 %v1309_v8  ;;  %1248 = vmatprep.subr.bf16.mxu0 %v1247_v9  ;;  %v248_v8 = vld [vmem:[%s1807_s4 + $0x48] sm:$0xff]  ;;  %v247_v9 = vld [vmem:[%s1807_s4 + $0x40] sm:$0xff]  ;;  %v250_v10 = vld [vmem:[%s1807_s4 + $0x58] sm:$0xff] }
  0x97   : > { %1312 = vmatprep.subr.bf16.mxu1 %v1311_v13  ;;  %v249_v11 = vld [vmem:[%s1807_s4 + $0x50] sm:$0xff]  ;;  %v251_v13 = vld [vmem:[%s1807_s4 + $0x60] sm:$0xff]  ;;  %v254_v14 = vld [vmem:[%s1807_s4 + $0x78] sm:$0xff] }
  0x98   : > { %v253_v15 = vld [vmem:[%s1807_s4 + $0x70] sm:$0xff] }
  0x99   : > { %1250 = vmatpush1.bf16.msra.mxu0 %v1249_v19 }
  0x9a   : > { %1314 = vmatpush1.bf16.msra.mxu1 %v1313_v20  ;;  %1252 = vmatprep.subr.bf16.mxu0 %v1251_v21 }
  0x9b   : > { %1316 = vmatprep.subr.bf16.mxu1 %v1315_v25 }
  0x9d   : > { %1254 = vmatpush1.bf16.msra.mxu0 %v1253_v31 }
  0x9e   : > { %1318 = vmatpush1.bf16.msra.mxu1 %v1317_v32  ;;  %1256 = vmatprep.subr.bf16.mxu0 %v1255_v33 }
  0x9f   : > { %1320 = vmatprep.subr.bf16.mxu1 %v1319_v37 }
  0xa1   : > { %1258 = vmatpush1.bf16.msra.mxu0 %v1257_v43 }
  0xa2   : > { %1322 = vmatpush1.bf16.msra.mxu1 %v1321_v44  ;;  %1260 = vmatprep.subr.bf16.mxu0 %v1259_v45 }
  0xa3   : > { %1324 = vmatprep.subr.bf16.mxu1 %v1323_v49 }
  0xa5   : > { %1262 = vmatpush1.bf16.msra.mxu0 %v1261_v55 }
  0xa6   : > { %1326 = vmatpush1.bf16.msra.mxu1 %v1325_v56  ;;  %1264 = vmatprep.subr.bf16.mxu0 %v1263_v57 }
  0xa7   : > { %1328 = vmatprep.subr.bf16.mxu1 %v1327_v60 }
  0xa9   : > { %1266 = vmatpush1.bf16.msra.mxu0 %v1265_v63 }
  0xaa   : > { %1330 = vmatpush1.bf16.msra.mxu1 %v1329_v0 }
  0xac   : > { %448 = vmatmul.mubr.f32.vlgmr.msra.gmra.mrb[0].mxu0 %v239_v1 }
  0xad   : > { %561 = vmatmul.mubr.f32.vlgmr.msra.gmra.mrb[0].mxu1 %v239_v1  ;;  %453 = vmatprep.mubr.f32.mxu0 %v242_v2 }
  0xae   : > { %566 = vmatprep.mubr.f32.mxu1 %v242_v2 }
  0xb0   : > { %454 = vmatmul.mubr.f32.gmra.mrb[2].mxu0 %v241_v3 }
  0xb1   : > { %567 = vmatmul.mubr.f32.gmra.mrb[2].mxu1 %v241_v3  ;;  %459 = vmatprep.mubr.f32.mxu0 %v244_v4 }
  0xb2   : > { %572 = vmatprep.mubr.f32.mxu1 %v244_v4 }
  0xb4   : > { %460 = vmatmul.mubr.f32.gmra.mrb[4].mxu0 %v243_v5 }
  0xb5   : > { %573 = vmatmul.mubr.f32.gmra.mrb[4].mxu1 %v243_v5  ;;  %465 = vmatprep.mubr.f32.mxu0 %v246_v6 }
  0xb6   : > { %578 = vmatprep.mubr.f32.mxu1 %v246_v6 }
  0xb8   : > { %466 = vmatmul.mubr.f32.gmra.mrb[6].mxu0 %v245_v7 }
  0xb9   : > { %579 = vmatmul.mubr.f32.gmra.mrb[6].mxu1 %v245_v7  ;;  %471 = vmatprep.mubr.f32.mxu0 %v248_v8 }
  0xba   : > { %584 = vmatprep.mubr.f32.mxu1 %v248_v8 }
  0xbc   : > { %472 = vmatmul.mubr.f32.gmra.mrb[8].mxu0 %v247_v9 }
  0xbd   : > { %585 = vmatmul.mubr.f32.gmra.mrb[8].mxu1 %v247_v9  ;;  %477 = vmatprep.mubr.f32.mxu0 %v250_v10 }
  0xbe   : > { %590 = vmatprep.mubr.f32.mxu1 %v250_v10 }
  0xc0   : > { %478 = vmatmul.mubr.f32.gmra.mrb[10].mxu0 %v249_v11 }
  0xc1   : > { %591 = vmatmul.mubr.f32.gmra.mrb[10].mxu1 %v249_v11  ;;  %483 = vmatprep.mubr.f32.mxu0 %v252_v12 }
  0xc2   : > { %596 = vmatprep.mubr.f32.mxu1 %v252_v12 }
  0xc4   : > { %484 = vmatmul.mubr.f32.gmra.mrb[12].mxu0 %v251_v13 }
  0xc5   : > { %597 = vmatmul.mubr.f32.gmra.mrb[12].mxu1 %v251_v13  ;;  %489 = vmatprep.mubr.f32.mxu0 %v254_v14 }
  0xc6   : > { %602 = vmatprep.mubr.f32.mxu1 %v254_v14 }
  0xc8   : > { %490 = vmatmul.mubr.f32.gmra.mrb[14].mxu0 %v253_v15 }
  0xc9   : > { %603 = vmatmul.mubr.f32.gmra.mrb[14].mxu1 %v253_v15 }
 0x17f   : > { %v449_v16 = vpop.f32.mrb[0].mxu0 }
 0x180   : > { %v562_v17 = vpop.f32.mrb[0].mxu1  ;;  %v451_v18 = vpop.f32.mrb[1].mxu0 }
 0x181   : > { %v564_v19 = vpop.f32.mrb[1].mxu1 }
 0x183   : > { %v455_v20 = vpop.f32.mrb[2].mxu0 }
 0x184   : > { %v1112_v21 = vpack.c.bf16 %v455_v20, %v449_v16  ;;  %v568_v22 = vpop.f32.mrb[2].mxu1  ;;  %v457_v23 = vpop.f32.mrb[3].mxu0 }
 0x185   : > { %v1132_v24 = vpack.c.bf16 %v568_v22, %v562_v17  ;;  %v1152_v25 = vpack.c.bf16 %v457_v23, %v451_v18  ;;  %v570_v26 = vpop.f32.mrb[3].mxu1 }
 0x186   : > { %1113 = vst [vmem:[%s1834_s24] sm:$0xff] %v1112_v21   ;;  %v1172_v27 = vpack.c.bf16 %v570_v26, %v564_v19 }
 0x187   : > { %1133 = vst [vmem:[%s1837_s25] sm:$0xff] %v1132_v24   ;;  %1195 = vst [vmem:[%s1834_s24 + $0x20] sm:$0xff] %v1152_v25   ;;  %v461_v28 = vpop.f32.mrb[4].mxu0 }
 0x188   : > { %1199 = vst [vmem:[%s1837_s25 + $0x20] sm:$0xff] %v1172_v27   ;;  %v574_v29 = vpop.f32.mrb[4].mxu1  ;;  %v463_v30 = vpop.f32.mrb[5].mxu0 }
 0x189   : > { %v576_v31 = vpop.f32.mrb[5].mxu1 }
 0x18b   : > { %v467_v32 = vpop.f32.mrb[6].mxu0 }
 0x18c   : > { %v1117_v33 = vpack.c.bf16 %v467_v32, %v461_v28  ;;  %v580_v34 = vpop.f32.mrb[6].mxu1  ;;  %v469_v35 = vpop.f32.mrb[7].mxu0 }
 0x18d   : > { %v1137_v36 = vpack.c.bf16 %v580_v34, %v574_v29  ;;  %v1157_v37 = vpack.c.bf16 %v469_v35, %v463_v30  ;;  %v582_v38 = vpop.f32.mrb[7].mxu1 }
 0x18e   : > { %1189 = vst [vmem:[%s1834_s24 + $0x8] sm:$0xff] %v1117_v33   ;;  %v1177_v39 = vpack.c.bf16 %v582_v38, %v576_v31 }
 0x18f   : > { %1192 = vst [vmem:[%s1837_s25 + $0x8] sm:$0xff] %v1137_v36   ;;  %1196 = vst [vmem:[%s1834_s24 + $0x28] sm:$0xff] %v1157_v37   ;;  %v473_v40 = vpop.f32.mrb[8].mxu0 }
 0x190   : > { %1200 = vst [vmem:[%s1837_s25 + $0x28] sm:$0xff] %v1177_v39   ;;  %v586_v41 = vpop.f32.mrb[8].mxu1  ;;  %v475_v42 = vpop.f32.mrb[9].mxu0 }
 0x191   : > { %v588_v43 = vpop.f32.mrb[9].mxu1 }
 0x193   : > { %v479_v44 = vpop.f32.mrb[10].mxu0 }
 0x194   : > { %v1122_v45 = vpack.c.bf16 %v479_v44, %v473_v40  ;;  %v592_v46 = vpop.f32.mrb[10].mxu1  ;;  %v481_v47 = vpop.f32.mrb[11].mxu0 }
 0x195   : > { %v1142_v48 = vpack.c.bf16 %v592_v46, %v586_v41  ;;  %v1162_v49 = vpack.c.bf16 %v481_v47, %v475_v42  ;;  %v594_v50 = vpop.f32.mrb[11].mxu1 }
 0x196   : > { %1190 = vst [vmem:[%s1834_s24 + $0x10] sm:$0xff] %v1122_v45   ;;  %v1182_v51 = vpack.c.bf16 %v594_v50, %v588_v43 }
 0x197   : > { %1193 = vst [vmem:[%s1837_s25 + $0x10] sm:$0xff] %v1142_v48   ;;  %1197 = vst [vmem:[%s1834_s24 + $0x30] sm:$0xff] %v1162_v49   ;;  %v485_v52 = vpop.f32.mrb[12].mxu0 }
 0x198   : > { %1201 = vst [vmem:[%s1837_s25 + $0x30] sm:$0xff] %v1182_v51   ;;  %v598_v53 = vpop.f32.mrb[12].mxu1  ;;  %v487_v54 = vpop.f32.mrb[13].mxu0 }
 0x199   : > { %v600_v55 = vpop.f32.mrb[13].mxu1 }
 0x19b   : > { %v491_v56 = vpop.f32.mrb[14].mxu0 }
 0x19c   : > { %v1127_v57 = vpack.c.bf16 %v491_v56, %v485_v52  ;;  %v604_v58 = vpop.f32.mrb[14].mxu1  ;;  %v493_v59 = vpop.f32.mrb[15].mxu0 }
 0x19d   : > { %v1147_v60 = vpack.c.bf16 %v604_v58, %v598_v53  ;;  %v1167_v61 = vpack.c.bf16 %v493_v59, %v487_v54  ;;  %v606_v62 = vpop.f32.mrb[15].mxu1 }
 0x19e   : > { %1191 = vst [vmem:[%s1834_s24 + $0x18] sm:$0xff] %v1127_v57   ;;  %v1187_v63 = vpack.c.bf16 %v606_v62, %v600_v55 }
 0x19f   : > { %1194 = vst [vmem:[%s1837_s25 + $0x18] sm:$0xff] %v1147_v60   ;;  %1198 = vst [vmem:[%s1834_s24 + $0x38] sm:$0xff] %v1167_v61  }
 0x1a0   : > { %1202 = vst [vmem:[%s1837_s25 + $0x38] sm:$0xff] %v1187_v63  }
 0x1a1   : > { %s1068_s6 = sshll.u32 %s1575_s15, 3  ;;  %s1069_s5 = sshll.u32 %s1579_s16, 5 }
 0x1a2   : > { %s789_s30 = sadd.s32 %s1069_s5, %s1068_s6  ;;  %s808_s8 = sshll.u32 %s1834_s24, 4  ;;  %s809_s8 = int_to_ptr.vmem [resolvable:$true] %s808_s8 }
 0x1a3   : > { %s1070_s7 = sshll.u32 %s789_s30, 6  ;;  %s1599_s23 = smov 512  }
 0x1a4   : > { %s791_s11 = scalar_lea.hbm %s1926_s2, %s1070_s7  ;;  %1337 = sst [smem:[#allocation11]] (%p1738_p11), %s1599_s23 }
 0x1a5   : > { %s1600_s20 = smov 1024   ;;  %s1601_s28 = smov 8  }
 0x1a6   : > { %1338 = sst [smem:[#allocation11 + $0x1]] (%p1738_p11), %s1600_s20  ;;  %s1602_s15 = smov 64  }
 0x1a7   : > { %1339 = sst [smem:[#allocation11 + $0x2]] (%p1738_p11), %s1601_s28  ;;  %s1603_s16 = smov 4  }
 0x1a8   : > { %1340 = sst [smem:[#allocation11 + $0x3]] (%p1738_p11), %s1602_s15  ;;  %s1604_s17 = smov [#allocation10]  }
 0x1a9   : > { %1341 = sst [smem:[#allocation11 + $0x4]] (%p1738_p11), %s1602_s15  ;;  %s1605_s4 = smov 0  }
 0x1aa   : > { %1342 = sst [smem:[#allocation11 + $0x5]] (%p1738_p11), %s1603_s16 }
 0x1ab   : > { %1343 = dma.general (%p1738_p11), %s809_s8, 1024, %s791_s11, %s772_s26, %s1604_s17, [#allocation11], %s1605_s4, 0  }
 0x1ac   : > { %s838_s6 = scalar_lea.hbm %s1927_s3, %s1070_s7  ;;  %s855_s5 = sshll.u32 %s1837_s25, 4  ;;  %s856_s5 = int_to_ptr.vmem [resolvable:$true] %s855_s5 }
 0x1ad   : > { %s1606_s30 = smov 512   ;;  %s1607_s9 = smov 1024  }
 0x1ae   : > { %1344 = sst [smem:[#allocation13]] (%p1738_p11), %s1606_s30  ;;  %s1608_s26 = smov 8  }
 0x1af   : > { %1345 = sst [smem:[#allocation13 + $0x1]] (%p1738_p11), %s1607_s9  ;;  %s1609_s8 = smov 64  }
 0x1b0   : > { %1346 = sst [smem:[#allocation13 + $0x2]] (%p1738_p11), %s1608_s26  ;;  %s1610_s10 = smov 4  }
 0x1b1   : > { %1347 = sst [smem:[#allocation13 + $0x3]] (%p1738_p11), %s1609_s8  ;;  %s1611_s7 = smov [#allocation12]  }
 0x1b2   : > { %1348 = sst [smem:[#allocation13 + $0x4]] (%p1738_p11), %s1609_s8  ;;  %s1612_s25 = smov 0  }
 0x1b3   : > { %1349 = sst [smem:[#allocation13 + $0x5]] (%p1738_p11), %s1610_s10 }
 0x1b4   : > { %1350 = dma.general (%p1738_p11), %s856_s5, 1024, %s838_s6, %s777_s21, %s1611_s7, [#allocation13], %s1612_s25, 0  }
 0x1b5 PF: > { %s1955_s11 = sld [smem:[#allocation19_spill]]  ;;  %p1371_p6 = scmp.ge.s32.totalorder %s1591_s19, 2 }
 0x1b6   : > { %s883_s23 = sand.u32 1, %s1563_s12  }
 0x1b7   : > { %s884_s20 = scalar_lea.sflag [#allocation4], %s883_s23 }
 0x1bb   : > { %p1956_p8 = scmp.ne.s32.totalorder %s1955_s11, 0 }
 0x1bd   : > { %p1362_p10 = pnand %p1371_p6, %p1956_p8 }
 0x1bf   : > { %1554 = dma.done.wait (!%p1362_p10), %s884_s20, 1024  }
 0x1c0   : > { %1556 = vsyncadd (!%p1362_p10), %s884_s20, 4294966272  ;;  %s893_s28 = scalar_lea.sflag [#allocation9], %s883_s23 }
 0x1c1   : > { %1558 = dma.done.wait (!%p1362_p10), %s893_s28, 1024  }
 0x1c2   : > { %1560 = vsyncadd (!%p1362_p10), %s893_s28, 4294966272  ;;  %s24_s19 = sadd.s32 1, %s1591_s19   ;;  %s1957_s15 = sld [smem:[#allocation18_spill]] }
 0x1c3   : > { %p21_p12 = scmp.ge.s32.totalorder %s24_s19, 6   ;;  %s1958_s17 = sld [smem:[#allocation20_spill]] }
 0x1c4   : > { %s1959_s29 = sld [smem:[#allocation21_spill]]  ;;  %s1960_s12 = smov %s1567_s13 }
 0x1c5   : > { %s1961_s13 = smov %s1571_s14  ;;  %s1962_s14 = smov %s1755_s27 }
 0x1c6   : > { %s1963_s16 = smov %s1587_s18  ;;  %23 = sbr.rel (!%p21_p12) target bundleno = 12 (0xc), region = 106 }
 0x1ca   : > { %s1964_s18 = smov %s1959_s29 }
 0x1cd   :  { %898 = vsyncpa [#allocation3], 1 }
 0x1ce   :  { %900 = vsyncpa [#allocation3 + $0x1], 1 }
 0x1cf   :  { %901 = vsyncpa [#allocation6], 1 }
 0x1d0   :  { %902 = vsyncpa [#allocation4], 1 }
 0x1d1   :  { %904 = vsyncpa [#allocation4 + $0x1], 1 }
 0x1d2   :  { %905 = vsyncpa [#allocation9], 1 }
 0x1d3   :  { %907 = vsyncpa [#allocation9 + $0x1], 1 }

</bundles_post_ra>
